<compile_context>
chip_gen: v6e
topology: v6e:2x2x1
jax: 0.10.0
libtpu: 0.0.40
codegen_flags: <defaults>
</compile_context>

<pallas_src>
import jax
import jax.numpy as jnp
from jax.experimental import pallas as pl
from jax.experimental.pallas import tpu as pltpu


# ---------------------------------------------------------------------------
# Kernel
# ---------------------------------------------------------------------------
def _encoder_kernel(x_ref, w_ref, b_ref, mask_ref, out_ref):
    """One row-tile of the shared encoder: tanh(x @ W + b) * mask.

    x_ref:    (TM, D_in_p)   bf16 word-rep tile
    w_ref:    (D_in_p, D_out_p) bf16 weights (VMEM-resident across grid steps)
    b_ref:    (1, D_out_p)   f32 bias
    mask_ref: (TM, 1)        f32 mask (1.0 keep / 0.0 pad)
    out_ref:  (TM, D_out_p)  bf16 output tile
    """
    y = jnp.dot(x_ref[...], w_ref[...], preferred_element_type=jnp.float32)  # MXU, f32 acc
    y = jnp.tanh(y + b_ref[...])                                             # VPU + EUP
    y = y * mask_ref[...]                                                    # lane-broadcast
    out_ref[...] = y.astype(out_ref.dtype)


# ---------------------------------------------------------------------------
# Wrapper
# ---------------------------------------------------------------------------
def _round_up(x: int, m: int) -> int:
    return ((x + m - 1) // m) * m


def _choose_row_tile(m_rows: int, d_in_p: int, d_out_p: int,
                     budget_bytes: int = 12 * 1024 * 1024) -> int:
    """Largest row tile whose double-buffered footprint (+ resident W/b) fits the budget.

    Budget is kept under the most restrictive default scoped VMEM (v5e: 16 MiB)."""
    resident = 2 * (d_in_p * d_out_p * 2 + d_out_p * 4)          # bf16 W + f32 b (x2 bufs)
    for tm in (1024, 512, 256, 128, 64, 32, 16, 8):
        if tm > m_rows:
            continue
        per_step = 2 * (tm * d_in_p * 2 + tm * d_out_p * 2 + tm * 4)  # x, out (bf16), mask (f32)
        if resident + per_step <= budget_bytes:
            return tm
    return 8


def shared_encoder_pallas(word_rep: jax.Array, mask: jax.Array,
                          w: jax.Array, b: jax.Array) -> jax.Array:
    """word_rep: (B, S, D_in), mask: (B, S) -> (B, S, D_out) bf16."""
    B, S, D_in = word_rep.shape
    D_out = w.shape[1]
    M = B * S

    # Lane-dense padding of the feature dims; row padding to a tile multiple.
    D_in_p = _round_up(D_in, 128)
    D_out_p = _round_up(D_out, 128)
    M8 = _round_up(M, 8)
    TM = _choose_row_tile(M8, D_in_p, D_out_p)
    M_p = _round_up(M8, TM)

    x2d = word_rep.reshape(M, D_in).astype(jnp.bfloat16)
    x2d = jnp.pad(x2d, ((0, M_p - M), (0, D_in_p - D_in)))
    m2d = mask.reshape(M, 1).astype(jnp.float32)
    m2d = jnp.pad(m2d, ((0, M_p - M), (0, 0)))
    w_p = jnp.pad(w.astype(jnp.bfloat16), ((0, D_in_p - D_in), (0, D_out_p - D_out)))
    b_p = jnp.pad(b.astype(jnp.float32).reshape(1, D_out), ((0, 0), (0, D_out_p - D_out)))

    grid = (M_p // TM,)
    out = pl.pallas_call(
        _encoder_kernel,
        out_shape=jax.ShapeDtypeStruct((M_p, D_out_p), jnp.bfloat16),
        grid_spec=pltpu.PrefetchScalarGridSpec(
            num_scalar_prefetch=0,
            grid=grid,
            in_specs=[
                pl.BlockSpec((TM, D_in_p), lambda i: (i, 0)),        # streamed rows
                pl.BlockSpec((D_in_p, D_out_p), lambda i: (0, 0)),   # resident weights
                pl.BlockSpec((1, D_out_p), lambda i: (0, 0)),        # resident bias
                pl.BlockSpec((TM, 1), lambda i: (i, 0)),             # streamed mask
            ],
            out_specs=pl.BlockSpec((TM, D_out_p), lambda i: (i, 0)),
        ),
        compiler_params=pltpu.CompilerParams(
            dimension_semantics=("parallel",)),
    )(x2d, w_p, b_p, m2d)

    return out[:M, :D_out].reshape(B, S, D_out)


# ---------------------------------------------------------------------------
# Module port
# ---------------------------------------------------------------------------
class MTLWeightSharer:
    """JAX/Pallas port of the shared-encoder MTLWeightSharer."""

    def __init__(self, in_dim: int, out_dim: int,
                 formalisms, formalisms_without_tagging,
                 task_dropout: float = 0.0, key=None):
        self.in_dim = in_dim
        self.out_dim = out_dim
        self.formalisms = list(formalisms)
        self.formalisms_without_tagging = set(formalisms_without_tagging)
        # TODO(synk): task_dropout only applies to task-specific encoders (absent in the
        # shared-encoder variant) and is identity at eval time -> intentionally a no-op.
        self.task_dropout = task_dropout
        if key is None:
            key = jax.random.PRNGKey(0)
        kw, kb = jax.random.split(key)
        # Shared-encoder parameters; weights kept in bf16 (MXU input dtype).
        self.w = (jax.random.normal(kw, (in_dim, out_dim), jnp.float32)
                  / jnp.sqrt(jnp.float32(in_dim))).astype(jnp.bfloat16)
        self.b = 0.01 * jax.random.normal(kb, (out_dim,), jnp.float32)

    def get_input_dim(self):
        return self.in_dim

    def get_output_dim(self):
        return self.out_dim

    def forward(self, formalism: str, word_rep: jax.Array, mask: jax.Array):
        encoded = shared_encoder_pallas(word_rep, mask, self.w, self.b)
        if formalism in self.formalisms_without_tagging:
            return encoded, None
        return encoded, encoded


# ---------------------------------------------------------------------------
# Demo / correctness check
# ---------------------------------------------------------------------------
if __name__ == "__main__":
    B, S, D = 2, 8, 32  # batch, seq_len, hidden
    key = jax.random.PRNGKey(0)
    k1, k2, k3 = jax.random.split(key, 3)

    word_rep = jax.random.normal(k1, (B, S, D), jnp.float32)
    # Mask: first batch fully valid, second batch has trailing padding.
    lengths = jnp.array([S, S - 3], dtype=jnp.int32)
    mask = (jnp.arange(S)[None, :] < lengths[:, None]).astype(jnp.float32)

    sharer = MTLWeightSharer(
        in_dim=D, out_dim=D,
        formalisms=["DM", "PSD", "AMR-2017"],
        formalisms_without_tagging=["AMR-2017"],
        task_dropout=0.0,
        key=k3,
    )

    parse_rep, tag_rep = sharer.forward("DM", word_rep, mask)
    parse_rep = jax.block_until_ready(parse_rep)
    tag_rep = jax.block_until_ready(tag_rep)

    # Reference in plain JAX (bf16 inputs, f32 accumulation — matches kernel numerics).
    x_bf = word_rep.astype(jnp.bfloat16).astype(jnp.float32)
    w_f32 = sharer.w.astype(jnp.float32)
    ref = jnp.tanh(x_bf @ w_f32 + sharer.b) * mask[..., None]

    assert parse_rep.shape == (B, S, D)
    assert parse_rep.dtype == jnp.bfloat16
    assert tag_rep is not None and tag_rep.shape == (B, S, D)
    assert jnp.allclose(parse_rep.astype(jnp.float32), ref, atol=2e-2, rtol=2e-2)

    # Formalism without tagging -> second output is None.
    parse_only, no_tag = sharer.forward("AMR-2017", word_rep, mask)
    parse_only = jax.block_until_ready(parse_only)
    assert no_tag is None
    assert jnp.allclose(parse_only.astype(jnp.float32), ref, atol=2e-2, rtol=2e-2)

    print("KERNEL_OK")
</pallas_src>

<mosaic_0001>
module attributes {stable_mosaic.version = 11 : i64} {
  func.func @_encoder_kernel(%arg0: i32, %arg1: memref<16x128xbf16, #tpu.memory_space<vmem>>, %arg2: memref<128x128xbf16, #tpu.memory_space<vmem>>, %arg3: memref<1x128xf32, #tpu.memory_space<vmem>>, %arg4: memref<16x1xf32, #tpu.memory_space<vmem>>, %arg5: memref<16x128xbf16, #tpu.memory_space<vmem>>) attributes {dimension_semantics = [#tpu.dimension_semantics<parallel>], iteration_bounds = array<i64: 1>, scalar_prefetch = 0 : i64, scratch_operands = 0 : i64, tpu.core_type = #tpu.core_type<tc>, window_params = [{transform_indices = @transform_0, window_bounds = array<i64: 16, 128>}, {pipeline_mode = #tpu.pipeline_mode<synchronous>, transform_indices = @transform_1, window_bounds = array<i64: 128, 128>}, {pipeline_mode = #tpu.pipeline_mode<synchronous>, transform_indices = @transform_2, window_bounds = array<i64: 1, 128>}, {transform_indices = @transform_3, window_bounds = array<i64: 16, 1>}, {transform_indices = @transform_4, window_bounds = array<i64: 16, 128>}]} {
    %c0 = arith.constant 0 : index
    %c0_0 = arith.constant 0 : index
    %0 = vector.load %arg1[%c0, %c0_0] : memref<16x128xbf16, #tpu.memory_space<vmem>>, vector<16x128xbf16>
    %c0_1 = arith.constant 0 : index
    %c0_2 = arith.constant 0 : index
    %1 = vector.load %arg2[%c0_1, %c0_2] : memref<128x128xbf16, #tpu.memory_space<vmem>>, vector<128x128xbf16>
    %cst = arith.constant dense<0.000000e+00> : vector<16x128xf32>
    %2 = tpu.matmul %0, %1, %cst {dimension_numbers = #tpu.dot_dimension_numbers<[1], [0], [0], [1], [0, 0, 1, 1], [], []>} : vector<16x128xbf16>, vector<128x128xbf16>, vector<16x128xf32> -> vector<16x128xf32>
    %c0_3 = arith.constant 0 : index
    %c0_4 = arith.constant 0 : index
    %3 = vector.load %arg3[%c0_3, %c0_4] : memref<1x128xf32, #tpu.memory_space<vmem>>, vector<1x128xf32>
    %4 = vector.broadcast %3 : vector<1x128xf32> to vector<16x128xf32>
    %5 = arith.addf %2, %4 : vector<16x128xf32>
    %6 = math.tanh %5 : vector<16x128xf32>
    %c0_5 = arith.constant 0 : index
    %c0_6 = arith.constant 0 : index
    %7 = vector.load %arg4[%c0_5, %c0_6] : memref<16x1xf32, #tpu.memory_space<vmem>>, vector<16x1xf32>
    %8 = vector.broadcast %7 : vector<16x1xf32> to vector<16x128xf32>
    %9 = arith.mulf %6, %8 : vector<16x128xf32>
    %10 = arith.truncf %9 : vector<16x128xf32> to vector<16x128xbf16>
    %c0_7 = arith.constant 0 : index
    %c0_8 = arith.constant 0 : index
    %11 = vector.load %arg5[%c0_7, %c0_8] : memref<16x128xbf16, #tpu.memory_space<vmem>>, vector<16x128xbf16>
    tpu.vector_store %arg5[%c0_7, %c0_8], %10 {strides = array<i32>} : memref<16x128xbf16, #tpu.memory_space<vmem>>, vector<16x128xbf16>,
    return
  }
  func.func @transform_0(%arg0: i32) -> (i32, i32) {
    %c0_i32 = arith.constant 0 : i32
    %c0_i32_0 = arith.constant 0 : i32
    return %arg0, %c0_i32 : i32, i32
  }
  func.func @transform_1(%arg0: i32) -> (i32, i32) {
    %c0_i32 = arith.constant 0 : i32
    %c0_i32_0 = arith.constant 0 : i32
    %c0_i32_1 = arith.constant 0 : i32
    return %c0_i32, %c0_i32_0 : i32, i32
  }
  func.func @transform_2(%arg0: i32) -> (i32, i32) {
    %c0_i32 = arith.constant 0 : i32
    %c0_i32_0 = arith.constant 0 : i32
    %c0_i32_1 = arith.constant 0 : i32
    return %c0_i32, %c0_i32_0 : i32, i32
  }
  func.func @transform_3(%arg0: i32) -> (i32, i32) {
    %c0_i32 = arith.constant 0 : i32
    %c0_i32_0 = arith.constant 0 : i32
    return %arg0, %c0_i32 : i32, i32
  }
  func.func @transform_4(%arg0: i32) -> (i32, i32) {
    %c0_i32 = arith.constant 0 : i32
    %c0_i32_0 = arith.constant 0 : i32
    return %arg0, %c0_i32 : i32, i32
  }
}

</mosaic_0001>

<bundles_post_ra>
// kernel: tpu_custom_call.1
= control target key start
LH: loop header
LB: loop body
LE: loop exit
PB: predicated region body
PF: predicated region fallthrough
CT: control target
= control target key end

     0   :  { %9 = vsyncpa [#allocation3], 0  ;;  %s365_s0 = inlined_call_operand.vmem [shape: bf16[16,128], index: 0, kind: input, shape index: {}]   ;;  %s366_s1 = inlined_call_operand.hbm [shape: bf16[128,128], index: 1, kind: input, shape index: {}]   ;;  %s367_s2 = inlined_call_operand.vmem [shape: f32[1,128], index: 2, kind: input, shape index: {}]   ;;  %s368_s3 = inlined_call_operand.vmem [shape: f32[16,1], index: 3, kind: input, shape index: {}]   ;;  %s369_s4 = inlined_call_operand.hbm [shape: bf16[16,128], index: 4, kind: output, shape index: {}]  }
   0x1   :  { %10 = vsyncpa [#allocation4], 0  ;;  %s309_s15 = smov [#allocation2]  }
   0x2   :  { %s18_s16 = sshll.u32 %s309_s15, 4  ;;  %s19_s16 = int_to_ptr.vmem [resolvable:$true] %s18_s16 }
   0x3   :  { %s273_s17 = scalar_lea.vmem %s19_s16, 1024  ;;  %p278_p1 = scmp.lt.s32.totalorder %s19_s16, %s19_s16 }
   0x4   :  { %p274_p0 = scmp.ne.s32.totalorder %s19_s16, %s273_s17  ;;  %p279_p2 = scmp.lt.s32.totalorder %s273_s17, %s273_s17 }
   0x6   :  { %p280_p3 = por %p279_p2, %p278_p1 }
   0x8   :  { %p281_p4 = pnand %p280_p3, %p274_p0 }
   0xa   :  { %284 = shalt.err (!%p281_p4)
}
   0xb   :  { %s310_s18 = smov 64   ;;  %s311_s19 = smov 4  }
   0xc   :  { %24 = dma.hbm_to_vmem [thread:$0]  %s366_s1, 1024, %s19_s16, [#allocation3], %s310_s18, %s310_s18, %s311_s19  }
   0xd   :  { %305 = dma.done.wait [#allocation3], 1024  }
   0xe   :  { %306 = vsyncadd [#allocation3], 4294966272  ;;  %v312_v0 = vmov 0.0   ;;  %vm313_vm0 = vmmov 0   ;;  %v314_v1 = vmov 0   ;;  %v252_v2 = vld [vmem:[#allocation2 + $0x38] sm:$0xff]  }
   0xf   :  { %224 = vmatprep.subr.bf16.mxu0 %v312_v0  ;;  %240 = vmatprep.mubr.msk.bf16.mxu0 %vm313_vm0, %v312_v0  ;;  %v253_v3 = vld [vmem:[#allocation2 + $0x30] sm:$0xff]   ;;  %v254_v4 = vld [vmem:[#allocation2 + $0x28] sm:$0xff]   ;;  %v155_v5 = vld [vmem:[%s368_s3] sm:$0xff]  ;;  %s315_s28 = smov [#allocation5]  }
  0x10   :  { %251 = vset.pattern.permute.xlu0 %v314_v1  ;;  %225 = vmatpush3.bf16.msra.mxu0 %v252_v2  ;;  %v255_v6 = vld [vmem:[#allocation2 + $0x20] sm:$0xff]   ;;  %v156_v7 = vld [vmem:[%s368_s3 + $0x8] sm:$0xff]  ;;  %v256_v8 = vld [vmem:[#allocation2 + $0x18] sm:$0xff]  }
  0x11   :  { %226 = vmatprep.subr.bf16.mxu0 %v312_v0  ;;  %159 = vperm.xlu0 %251, %v155_v5   ;;  %v257_v9 = vld [vmem:[#allocation2 + $0x10] sm:$0xff]   ;;  %v258_v10 = vld [vmem:[#allocation2 + $0x8] sm:$0xff]   ;;  %v259_v11 = vld [vmem:[#allocation2] sm:$0xff]  }
  0x12   :  { %v260_v12 = vld [vmem:[%s365_s0] sm:$0xff]   ;;  %s184_s0 = sshll.u32 %s315_s28, 4  ;;  %s185_s0 = int_to_ptr.vmem [resolvable:$true] %s184_s0 }
  0x13   :  { %v196_v13 = vld [vmem:[%s367_s2] ss:$0 sm:$0xff]  ;;  %s285_s2 = scalar_lea.vmem %s185_s0, 128  ;;  %p290_p6 = scmp.lt.s32.totalorder %s185_s0, %s185_s0 }
  0x14   :  { %227 = vmatpush3.bf16.msra.mxu0 %v253_v3  ;;  %p286_p5 = scmp.ne.s32.totalorder %s185_s0, %s285_s2  ;;  %p291_p7 = scmp.lt.s32.totalorder %s285_s2, %s285_s2 }
  0x15   :  { %228 = vmatprep.subr.bf16.mxu0 %v312_v0  ;;  %164 = vperm.xlu0 %251, %v156_v7  }
  0x16   :  { %p292_p8 = por %p291_p7, %p290_p6 }
  0x18   :  { %229 = vmatpush3.bf16.msra.mxu0 %v254_v4  ;;  %p293_p9 = pnand %p292_p8, %p286_p5 }
  0x19   :  { %230 = vmatprep.subr.bf16.mxu0 %v312_v0 }
  0x1c   :  { %231 = vmatpush3.bf16.msra.mxu0 %v255_v6 }
  0x1d   :  { %232 = vmatprep.subr.bf16.mxu0 %v312_v0 }
  0x20   :  { %233 = vmatpush3.bf16.msra.mxu0 %v256_v8 }
  0x21   :  { %234 = vmatprep.subr.bf16.mxu0 %v312_v0 }
  0x24   :  { %235 = vmatpush3.bf16.msra.mxu0 %v257_v9 }
  0x25   :  { %236 = vmatprep.subr.bf16.mxu0 %v312_v0 }
  0x28   :  { %237 = vmatpush3.bf16.msra.mxu0 %v258_v10 }
  0x29   :  { %238 = vmatprep.subr.bf16.mxu0 %v312_v0 }
  0x2c   :  { %239 = vmatpush3.bf16.msra.mxu0 %v259_v11 }
  0x2f   :  { %241 = vmatmul.mubr.bf16.vlgmr.msra.gmra.mxu0 %v260_v12 }
  0x8c   :  { %v160_v20 = vpop.permute.xlu0 %159 }
  0x90   :  { %v165_v23 = vpop.permute.xlu0 %164 }
  0xef   :  { %v146_v14 = vpop.f32.mrf.mxu0 }
  0xf0   :  { %v147_v15 = vadd.f32 %v196_v13, %v146_v14 }
  0xf1   :  { %v242_v16 = vpop.f32.mrf.mxu0 }
  0xf2   :  { %261 = vtanh.f32 %v147_v15 }
  0xf3   :  { %v149_v17 = vpop.f32.mrf.mxu0 }
  0xf4   :  { %v150_v18 = vadd.f32 %v196_v13, %v149_v17 }
  0xf5   :  { %v243_v19 = vpop.f32.mrf.mxu0 }
  0xf6   :  { %263 = vtanh.f32 %v150_v18 }
  0xff   :  { %v262_v21 = vpop.eup %261 }
 0x100   :  { %v167_v24 = vmul.f32 %v262_v21, %v160_v20 }
 0x103   :  { %v264_v22 = vpop.eup %263 }
 0x104   :  { %v168_v25 = vmul.f32 %v264_v22, %v165_v23 }
 0x106   :  { %v213_v26 = vpack.c.bf16 %v168_v25, %v167_v24 }
 0x108   :  { %214 = vst [vmem:[#allocation5] sm:$0xff] %v213_v26  }
 0x109   :  { %296 = shalt.err (!%p293_p9)
}
 0x10a   :  { %190 = dma.vmem_to_hbm [thread:$0]  %s185_s0, 128, %s369_s4, [#allocation4], %s310_s18, %s310_s18, %s311_s19  }
 0x10b   :  { %307 = dma.done.wait [#allocation4], 128  }
 0x10c   :  { %308 = vsyncadd [#allocation4], 4294967168 }
 0x10d   :  { %194 = vsyncpa [#allocation3], 1 }
 0x10e   :  { %195 = vsyncpa [#allocation4], 1 }

</bundles_post_ra>
